<compile_context>
chip_gen: v7x
topology: tpu7x:2x2x1
jax: 0.10.0
libtpu: 0.0.40
codegen_flags: <defaults>
</compile_context>

<pallas_src>
import functools

import jax
import jax.numpy as jnp
from jax.experimental import pallas as pl
from jax.experimental.pallas import tpu as pltpu


def _round_up(x, m):
    return ((x + m - 1) // m) * m


def _mlp_kernel(*refs, activations):
    """Fused forward: h = act_L(...act_1(x @ W1 + b1)... @ WL + bL).

    refs = (x_ref, w0_ref, b0_ref, w1_ref, b1_ref, ..., o_ref)
    All tensors are f32, lane-dense (feature dims padded to 128 multiples).
    """
    x_ref = refs[0]
    o_ref = refs[-1]
    param_refs = refs[1:-1]

    h = x_ref[...]
    for li, act in enumerate(activations):
        w = param_refs[2 * li][...]        # (Din_pad, Dout_pad)
        b = param_refs[2 * li + 1][...]    # (1, Dout_pad)
        h = jnp.dot(h, w, preferred_element_type=jnp.float32) + b
        if act == "relu":
            h = jnp.maximum(h, 0.0)
        elif act == "sigmoid":
            # 1 / (1 + exp(-h)): exp + approximate reciprocal both hit the EUP.
            h = pl.reciprocal(1.0 + jnp.exp(-h), approx=True)
        # 'identity' (or any other string, matching the PyTorch fallback): no-op
    o_ref[...] = h.astype(o_ref.dtype)


def _fused_mlp_call(x_pad, flat_params, activations, dout_pad, tile_b=None):
    """Single pallas_call running the whole (padded) MLP."""
    Bp, din_pad = x_pad.shape
    kernel = functools.partial(_mlp_kernel, activations=tuple(activations))
    n_inputs = 1 + len(flat_params)
    out_shape = jax.ShapeDtypeStruct((Bp, dout_pad), jnp.float32)

    if tile_b is None:
        # Small batch: no grid, no pipeline machinery; everything lives in VMEM
        # (a few hundred KB at most for this module's shapes).
        vmem = pltpu.MemorySpace.VMEM
        return pl.pallas_call(
            kernel,
            out_shape=out_shape,
            in_specs=[pl.BlockSpec(memory_space=vmem)] * n_inputs,
            out_specs=pl.BlockSpec(memory_space=vmem),
        )(x_pad, *flat_params)

    # Large batch: tile only the batch axis; weights are tiny and stay resident.
    # tile_b <= 512 keeps double-buffered x/out tiles well inside v7x's 64 MiB
    # VMEM (and the 32 MiB scoped default).
    grid = (Bp // tile_b,)
    in_specs = [pl.BlockSpec((tile_b, din_pad), lambda i: (i, 0))]
    for p in flat_params:
        in_specs.append(pl.BlockSpec(p.shape, lambda i: (0, 0)))
    return pl.pallas_call(
        kernel,
        out_shape=out_shape,
        grid=grid,
        in_specs=in_specs,
        out_specs=pl.BlockSpec((tile_b, dout_pad), lambda i: (i, 0)),
        compiler_params=pltpu.CompilerParams(
            dimension_semantics=("parallel",)
        ),
    )(x_pad, *flat_params)


class NeuralNetworkPallas:
    """JAX/Pallas mirror of the PyTorch NeuralNetwork module (forward pass)."""

    def __init__(self, n_input_vars, neurons, activations, key):
        assert len(neurons) == len(activations)
        self.activations = list(activations)
        self.input_dim = n_input_vars
        self.out_dim = neurons[-1] if neurons else n_input_vars
        self.din_pad = _round_up(max(n_input_vars, 1), 128)

        self.flat_params = []   # padded, lane-dense: [w0_t, b0, w1_t, b1, ...]
        self._ref_params = []   # unpadded, for the pure-JAX reference
        fan_in = n_input_vars
        pad_in = self.din_pad
        for fan_out in neurons:
            key, kw, kb = jax.random.split(key, 3)
            # Mimic nn.Linear default init: U(-1/sqrt(fan_in), 1/sqrt(fan_in))
            bound = 1.0 / (fan_in ** 0.5)
            w = jax.random.uniform(kw, (fan_out, fan_in), jnp.float32, -bound, bound)
            b = jax.random.uniform(kb, (fan_out,), jnp.float32, -bound, bound)

            pad_out = _round_up(fan_out, 128)
            # Zero-pad: padded weight ROWS are zero, so activations living in
            # padded input columns (e.g. sigmoid(0)=0.5) contribute nothing.
            w_t_pad = jnp.zeros((pad_in, pad_out), jnp.float32).at[:fan_in, :fan_out].set(w.T)
            b_pad = jnp.zeros((1, pad_out), jnp.float32).at[0, :fan_out].set(b)
            self.flat_params += [w_t_pad, b_pad]
            self._ref_params.append((w.T, b))

            fan_in = fan_out
            pad_in = pad_out
        self.dout_pad_last = pad_in

    def __call__(self, x):
        if not self.activations:          # no layers -> identity, like the module
            return x
        B, Din = x.shape
        assert Din == self.input_dim
        if B <= 1024:
            tile_b = None
            Bp = _round_up(B, 8)
        else:
            tile_b = 512
            Bp = _round_up(B, tile_b)
        x_pad = jnp.zeros((Bp, self.din_pad), jnp.float32).at[:B, :Din].set(
            x.astype(jnp.float32)
        )
        out_pad = _fused_mlp_call(
            x_pad, self.flat_params, self.activations, self.dout_pad_last, tile_b
        )
        return out_pad[:B, : self.out_dim]

    def reference(self, x):
        """Pure-JAX reference matching the PyTorch forward."""
        h = x.astype(jnp.float32)
        for (w_t, b), act in zip(self._ref_params, self.activations):
            h = h @ w_t + b
            if act == "relu":
                h = jnp.maximum(h, 0.0)
            elif act == "sigmoid":
                h = jax.nn.sigmoid(h)
        return h


if __name__ == "__main__":
    key = jax.random.PRNGKey(0)
    key, kx, kp = jax.random.split(key, 3)

    # Small, forward-consistent shapes: batch=8 houses, 13 input features,
    # hidden layers [32, 16], scalar regression output.
    batch = 8
    n_input_vars = 13
    neurons = [32, 16, 1]
    activations = ["relu", "sigmoid", "identity"]

    x = jax.random.normal(kx, (batch, n_input_vars), jnp.float32)

    model = NeuralNetworkPallas(n_input_vars, neurons, activations, kp)
    out = model(x)
    out = jax.block_until_ready(out)

    assert out.shape == (batch, 1)
    assert out.dtype == jnp.float32

    ref = jax.block_until_ready(model.reference(x))
    # Loose tolerance: pl.reciprocal(approx=True) in sigmoid is an EUP approximation.
    assert jnp.allclose(out, ref, rtol=1e-2, atol=1e-2), (out, ref)

    print("KERNEL_OK")
</pallas_src>

<mosaic_0001>
module attributes {stable_mosaic.version = 11 : i64} {
  func.func @_mlp_kernel(%arg0: memref<8x128xf32, #tpu.memory_space<vmem>>, %arg1: memref<128x128xf32, #tpu.memory_space<vmem>>, %arg2: memref<1x128xf32, #tpu.memory_space<vmem>>, %arg3: memref<128x128xf32, #tpu.memory_space<vmem>>, %arg4: memref<1x128xf32, #tpu.memory_space<vmem>>, %arg5: memref<128x128xf32, #tpu.memory_space<vmem>>, %arg6: memref<1x128xf32, #tpu.memory_space<vmem>>, %arg7: memref<8x128xf32, #tpu.memory_space<vmem>>) attributes {dimension_semantics = [], scalar_prefetch = 0 : i64, scratch_operands = 0 : i64, tpu.core_type = #tpu.core_type<tc>} {
    %c0 = arith.constant 0 : index
    %c0_0 = arith.constant 0 : index
    %0 = vector.load %arg0[%c0, %c0_0] : memref<8x128xf32, #tpu.memory_space<vmem>>, vector<8x128xf32>
    %c0_1 = arith.constant 0 : index
    %c0_2 = arith.constant 0 : index
    %1 = vector.load %arg1[%c0_1, %c0_2] : memref<128x128xf32, #tpu.memory_space<vmem>>, vector<128x128xf32>
    %c0_3 = arith.constant 0 : index
    %c0_4 = arith.constant 0 : index
    %2 = vector.load %arg2[%c0_3, %c0_4] : memref<1x128xf32, #tpu.memory_space<vmem>>, vector<1x128xf32>
    %cst = arith.constant dense<0.000000e+00> : vector<8x128xf32>
    %3 = tpu.matmul %0, %1, %cst {dimension_numbers = #tpu.dot_dimension_numbers<[1], [0], [0], [1], [0, 0, 1, 1], [], []>} : vector<8x128xf32>, vector<128x128xf32>, vector<8x128xf32> -> vector<8x128xf32>
    %4 = vector.broadcast %2 : vector<1x128xf32> to vector<8x128xf32>
    %5 = arith.addf %3, %4 : vector<8x128xf32>
    %cst_5 = arith.constant 0.000000e+00 : f32
    %6 = vector.broadcast %cst_5 : f32 to vector<8x128xf32>
    %7 = arith.maximumf %5, %6 : vector<8x128xf32>
    %c0_6 = arith.constant 0 : index
    %c0_7 = arith.constant 0 : index
    %8 = vector.load %arg3[%c0_6, %c0_7] : memref<128x128xf32, #tpu.memory_space<vmem>>, vector<128x128xf32>
    %c0_8 = arith.constant 0 : index
    %c0_9 = arith.constant 0 : index
    %9 = vector.load %arg4[%c0_8, %c0_9] : memref<1x128xf32, #tpu.memory_space<vmem>>, vector<1x128xf32>
    %cst_10 = arith.constant dense<0.000000e+00> : vector<8x128xf32>
    %10 = tpu.matmul %7, %8, %cst_10 {dimension_numbers = #tpu.dot_dimension_numbers<[1], [0], [0], [1], [0, 0, 1, 1], [], []>} : vector<8x128xf32>, vector<128x128xf32>, vector<8x128xf32> -> vector<8x128xf32>
    %11 = vector.broadcast %9 : vector<1x128xf32> to vector<8x128xf32>
    %12 = arith.addf %10, %11 : vector<8x128xf32>
    %cst_11 = arith.constant 0.000000e+00 : f32
    %13 = vector.broadcast %cst_11 : f32 to vector<8x128xf32>
    %14 = arith.subf %13, %12 : vector<8x128xf32>
    %15 = math.exp %14 : vector<8x128xf32>
    %cst_12 = arith.constant 1.000000e+00 : f32
    %16 = vector.broadcast %cst_12 : f32 to vector<8x128xf32>
    %17 = arith.addf %16, %15 : vector<8x128xf32>
    %18 = tpu.reciprocal %17 {approx = true} : vector<8x128xf32> -> vector<8x128xf32>
    %c0_13 = arith.constant 0 : index
    %c0_14 = arith.constant 0 : index
    %19 = vector.load %arg5[%c0_13, %c0_14] : memref<128x128xf32, #tpu.memory_space<vmem>>, vector<128x128xf32>
    %c0_15 = arith.constant 0 : index
    %c0_16 = arith.constant 0 : index
    %20 = vector.load %arg6[%c0_15, %c0_16] : memref<1x128xf32, #tpu.memory_space<vmem>>, vector<1x128xf32>
    %cst_17 = arith.constant dense<0.000000e+00> : vector<8x128xf32>
    %21 = tpu.matmul %18, %19, %cst_17 {dimension_numbers = #tpu.dot_dimension_numbers<[1], [0], [0], [1], [0, 0, 1, 1], [], []>} : vector<8x128xf32>, vector<128x128xf32>, vector<8x128xf32> -> vector<8x128xf32>
    %22 = vector.broadcast %20 : vector<1x128xf32> to vector<8x128xf32>
    %23 = arith.addf %21, %22 : vector<8x128xf32>
    %c0_18 = arith.constant 0 : index
    %c0_19 = arith.constant 0 : index
    %24 = vector.load %arg7[%c0_18, %c0_19] : memref<8x128xf32, #tpu.memory_space<vmem>>, vector<8x128xf32>
    tpu.vector_store %arg7[%c0_18, %c0_19], %23 {strides = array<i32>} : memref<8x128xf32, #tpu.memory_space<vmem>>, vector<8x128xf32>,
    return
  }
}

</mosaic_0001>

<bundles_post_ra>
// kernel: tpu_custom_call.1
= control target key start
LH: loop header
LB: loop body
LE: loop exit
PB: predicated region body
PF: predicated region fallthrough
CT: control target
= control target key end

     0   :  { %12 = vsyncpa [#allocation3], 0  ;;  %s905_s0 = inlined_call_operand.hbm [shape: f32[8,128], index: 0, kind: input, shape index: {}]   ;;  %s906_s1 = inlined_call_operand.hbm [shape: f32[128,128], index: 1, kind: input, shape index: {}]   ;;  %s907_s2 = inlined_call_operand.vmem [shape: f32[1,128], index: 2, kind: input, shape index: {}]   ;;  %s908_s3 = inlined_call_operand.hbm [shape: f32[128,128], index: 3, kind: input, shape index: {}]   ;;  %s909_s4 = inlined_call_operand.vmem [shape: f32[1,128], index: 4, kind: input, shape index: {}]   ;;  %s910_s5 = inlined_call_operand.hbm [shape: f32[128,128], index: 5, kind: input, shape index: {}]   ;;  %s911_s6 = inlined_call_operand.vmem [shape: f32[1,128], index: 6, kind: input, shape index: {}]   ;;  %s912_s7 = inlined_call_operand.hbm [shape: f32[8,128], index: 7, kind: output, shape index: {}]  }
   0x1   :  { %13 = vsyncpa [#allocation6], 0 }
   0x2   :  { %14 = vsyncpa [#allocation9], 0 }
   0x3   :  { %15 = vsyncpa [#allocation4], 0  ;;  %s747_s24 = smov [#allocation5]   ;;  %s629_s28 = scalar_lea.hbm %s906_s1, 2048 }
   0x4   :  { %s31_s25 = sshll.u32 %s747_s24, 4  ;;  %p630_p0 = scmp.ne.s32.totalorder %s906_s1, %s629_s28  ;;  %s32_s25 = int_to_ptr.vmem [resolvable:$true] %s31_s25 }
   0x5   :  { %p633_p1 = scmp.lt.u32.totalorder %s629_s28, %s906_s1 }
   0x7   :  { %p635_p2 = pnand %p633_p1, %p630_p0 }
   0x9   :  { %638 = shalt.err (!%p635_p2)
}
   0xa   :  { %s639_s10 = scalar_lea.vmem %s32_s25, 2048  ;;  %p644_p4 = scmp.lt.s32.totalorder %s32_s25, %s32_s25 }
   0xb   :  { %p640_p3 = scmp.ne.s32.totalorder %s32_s25, %s639_s10  ;;  %p645_p5 = scmp.lt.s32.totalorder %s639_s10, %s639_s10 }
   0xd   :  { %p646_p6 = por %p645_p5, %p644_p4 }
   0xf   :  { %p647_p7 = pnand %p646_p6, %p640_p3 }
  0x11   :  { %650 = shalt.err (!%p647_p7)
}
  0x12   :  { %s748_s11 = smov 128   ;;  %s749_s12 = smov 8  }
  0x13   :  { %37 = dma.hbm_to_vmem [thread:$0]  %s906_s1, 2048, %s32_s25, [#allocation6], %s748_s11, %s748_s11, %s749_s12  }
  0x14   :  { %s750_s15 = smov [#allocation2]   ;;  %s751_s17 = smov [#allocation7]  }
  0x15   :  { %s22_s16 = sshll.u32 %s750_s15, 4  ;;  %s45_s18 = sshll.u32 %s751_s17, 4  ;;  %s23_s16 = int_to_ptr.vmem [resolvable:$true] %s22_s16  ;;  %s46_s18 = int_to_ptr.vmem [resolvable:$true] %s45_s18 }
  0x16   :  { %s651_s21 = scalar_lea.hbm %s905_s0, 128 }
  0x17   :  { %p652_p8 = scmp.ne.s32.totalorder %s905_s0, %s651_s21  ;;  %p655_p9 = scmp.lt.u32.totalorder %s651_s21, %s905_s0 }
  0x19   :  { %p657_p10 = pnand %p655_p9, %p652_p8 }
  0x1b   :  { %660 = shalt.err (!%p657_p10)
}
  0x1c   :  { %s661_s1 = scalar_lea.vmem %s23_s16, 128  ;;  %p666_p12 = scmp.lt.s32.totalorder %s23_s16, %s23_s16 }
  0x1d   :  { %p662_p11 = scmp.ne.s32.totalorder %s23_s16, %s661_s1  ;;  %p667_p13 = scmp.lt.s32.totalorder %s661_s1, %s661_s1 }
  0x1f   :  { %p668_p0 = por %p667_p13, %p666_p12 }
  0x21   :  { %p669_p1 = pnand %p668_p0, %p662_p11 }
  0x23   :  { %672 = shalt.err (!%p669_p1)
}
  0x24   :  { %25 = dma.hbm_to_vmem [thread:$0]  %s905_s0, 128, %s23_s16, [#allocation3]  }
  0x25   :  { %s673_s30 = scalar_lea.hbm %s908_s3, 2048 }
  0x26   :  { %p674_p2 = scmp.ne.s32.totalorder %s908_s3, %s673_s30  ;;  %p677_p3 = scmp.lt.u32.totalorder %s673_s30, %s908_s3 }
  0x28   :  { %p679_p4 = pnand %p677_p3, %p674_p2 }
  0x2a   :  { %682 = shalt.err (!%p679_p4)
}
  0x2b   :  { %s683_s14 = scalar_lea.vmem %s46_s18, 2048  ;;  %p688_p6 = scmp.lt.s32.totalorder %s46_s18, %s46_s18 }
  0x2c   :  { %p684_p5 = scmp.ne.s32.totalorder %s46_s18, %s683_s14  ;;  %p689_p7 = scmp.lt.s32.totalorder %s683_s14, %s683_s14 }
  0x2e   :  { %p690_p8 = por %p689_p7, %p688_p6 }
  0x30   :  { %p691_p9 = pnand %p690_p8, %p684_p5 }
  0x32   :  { %694 = shalt.err (!%p691_p9)
}
  0x33   :  { %51 = dma.hbm_to_vmem [thread:$0]  %s908_s3, 2048, %s46_s18, [#allocation6], %s748_s11, %s748_s11, %s749_s12  }
  0x34   :  { %s752_s16 = smov [#allocation8]   ;;  %s695_s21 = scalar_lea.hbm %s910_s5, 2048 }
  0x35   :  { %s59_s17 = sshll.u32 %s752_s16, 4  ;;  %p696_p10 = scmp.ne.s32.totalorder %s910_s5, %s695_s21  ;;  %s60_s17 = int_to_ptr.vmem [resolvable:$true] %s59_s17 }
  0x36   :  { %p699_p11 = scmp.lt.u32.totalorder %s695_s21, %s910_s5 }
  0x38   :  { %p701_p12 = pnand %p699_p11, %p696_p10 }
  0x3a   :  { %704 = shalt.err (!%p701_p12)
}
  0x3b   :  { %s705_s1 = scalar_lea.vmem %s60_s17, 2048  ;;  %p710_p0 = scmp.lt.s32.totalorder %s60_s17, %s60_s17 }
  0x3c   :  { %p706_p13 = scmp.ne.s32.totalorder %s60_s17, %s705_s1  ;;  %p711_p1 = scmp.lt.s32.totalorder %s705_s1, %s705_s1 }
  0x3e   :  { %p712_p2 = por %p711_p1, %p710_p0 }
  0x40   :  { %p713_p3 = pnand %p712_p2, %p706_p13 }
  0x42   :  { %716 = shalt.err (!%p713_p3)
}
  0x43   :  { %65 = dma.hbm_to_vmem [thread:$0]  %s910_s5, 2048, %s60_s17, [#allocation9], %s748_s11, %s748_s11, %s749_s12  }
  0x44   :  { %739 = dma.done.wait [#allocation3], 128  }
  0x45   :  { %740 = vsyncadd [#allocation3], 4294967168 }
  0x46   :  { %741 = dma.done.wait [#allocation6], 4096  }
  0x47   :  { %742 = vsyncadd [#allocation6], 4294963200 }
  0x48   :  { %743 = dma.done.wait [#allocation9], 2048  }
  0x49   :  { %744 = vsyncadd [#allocation9], 4294965248  ;;  %v753_v0 = vmov 0.0|0.0   ;;  %vm754_vm0 = vmmov 0   ;;  %v755_v1 = vmov 0.0   ;;  %v81_v2 = vld [vmem:[#allocation5] sm:$0xff] }
  0x4a   :  { %543 = vmatprep.subr.bf16.mxu0 %v753_v0  ;;  %470 = vmatprep.mubr.msk.f32.mxu0 %vm754_vm0, %v755_v1  ;;  %v82_v3 = vld [vmem:[#allocation5 + $0x8] sm:$0xff]  ;;  %v83_v4 = vld [vmem:[#allocation5 + $0x10] sm:$0xff]  ;;  %v84_v6 = vld [vmem:[#allocation5 + $0x18] sm:$0xff]  ;;  %s756_s28 = smov [#allocation10]  }
  0x4b   :  { %567 = vmatprep.subr.bf16.mxu1 %v753_v0  ;;  %505 = vmatprep.mubr.msk.f32.mxu1 %vm754_vm0, %v755_v1  ;;  %v544_v5 = vpack.c.bf16 %v82_v3, %v81_v2  ;;  %v547_v7 = vpack.c.bf16 %v84_v6, %v83_v4  ;;  %v85_v8 = vld [vmem:[#allocation5 + $0x20] sm:$0xff]  ;;  %v86_v9 = vld [vmem:[#allocation5 + $0x28] sm:$0xff]  ;;  %v177_v12 = vld [vmem:[#allocation7 + $0x10] sm:$0xff]  ;;  %s373_s29 = sshll.u32 %s756_s28, 4  ;;  %s374_s29 = int_to_ptr.vmem [resolvable:$true] %s373_s29 }
  0x4c   :  { %v175_v10 = vld [vmem:[#allocation7] sm:$0xff]  ;;  %v176_v11 = vld [vmem:[#allocation7 + $0x8] sm:$0xff]  ;;  %v178_v13 = vld [vmem:[#allocation7 + $0x18] sm:$0xff]  ;;  %v550_v14 = vpack.c.bf16 %v86_v9, %v85_v8  ;;  %p722_p5 = scmp.lt.s32.totalorder %s374_s29, %s374_s29 }
  0x4d   :  { %545 = vmatpush3.bf16.msra.mxu0 %v544_v5  ;;  %v568_v15 = vpack.c.bf16 %v176_v11, %v175_v10  ;;  %v87_v16 = vld [vmem:[#allocation5 + $0x30] sm:$0xff]  ;;  %v88_v17 = vld [vmem:[#allocation5 + $0x38] sm:$0xff]  ;;  %v571_v18 = vpack.c.bf16 %v178_v13, %v177_v12  ;;  %v179_v19 = vld [vmem:[#allocation7 + $0x20] sm:$0xff] }
  0x4e   :  { %546 = vmatprep.subr.bf16.mxu0 %v753_v0  ;;  %v180_v20 = vld [vmem:[#allocation7 + $0x28] sm:$0xff]  ;;  %v553_v21 = vpack.c.bf16 %v88_v17, %v87_v16  ;;  %v89_v22 = vld [vmem:[#allocation5 + $0x40] sm:$0xff]  ;;  %v181_v25 = vld [vmem:[#allocation7 + $0x30] sm:$0xff] }
  0x4f   :  { %569 = vmatpush3.bf16.msra.mxu1 %v568_v15  ;;  %v90_v23 = vld [vmem:[#allocation5 + $0x48] sm:$0xff]  ;;  %v574_v24 = vpack.c.bf16 %v180_v20, %v179_v19  ;;  %v182_v26 = vld [vmem:[#allocation7 + $0x38] sm:$0xff]  ;;  %v91_v28 = vld [vmem:[#allocation5 + $0x50] sm:$0xff] }
  0x50   :  { %570 = vmatprep.subr.bf16.mxu1 %v753_v0  ;;  %v556_v27 = vpack.c.bf16 %v90_v23, %v89_v22  ;;  %v92_v29 = vld [vmem:[#allocation5 + $0x58] sm:$0xff]  ;;  %v577_v30 = vpack.c.bf16 %v182_v26, %v181_v25  ;;  %v183_v31 = vld [vmem:[#allocation7 + $0x40] sm:$0xff]  ;;  %v184_v32 = vld [vmem:[#allocation7 + $0x48] sm:$0xff] }
  0x51   :  { %548 = vmatpush3.bf16.msra.mxu0 %v547_v7  ;;  %v559_v33 = vpack.c.bf16 %v92_v29, %v91_v28  ;;  %v93_v34 = vld [vmem:[#allocation5 + $0x60] sm:$0xff]  ;;  %v94_v35 = vld [vmem:[#allocation5 + $0x68] sm:$0xff]  ;;  %v580_v36 = vpack.c.bf16 %v184_v32, %v183_v31  ;;  %v185_v37 = vld [vmem:[#allocation7 + $0x50] sm:$0xff] }
  0x52   :  { %549 = vmatprep.subr.bf16.mxu0 %v753_v0  ;;  %v186_v38 = vld [vmem:[#allocation7 + $0x58] sm:$0xff]  ;;  %v562_v39 = vpack.c.bf16 %v94_v35, %v93_v34  ;;  %v95_v40 = vld [vmem:[#allocation5 + $0x70] sm:$0xff]  ;;  %v187_v43 = vld [vmem:[#allocation7 + $0x60] sm:$0xff] }
  0x53   :  { %572 = vmatpush3.bf16.msra.mxu1 %v571_v18  ;;  %v96_v41 = vld [vmem:[#allocation5 + $0x78] sm:$0xff]  ;;  %v583_v42 = vpack.c.bf16 %v186_v38, %v185_v37  ;;  %v188_v44 = vld [vmem:[#allocation7 + $0x68] sm:$0xff]  ;;  %v189_v48 = vld [vmem:[#allocation7 + $0x70] sm:$0xff] }
  0x54   :  { %573 = vmatprep.subr.bf16.mxu1 %v753_v0  ;;  %v565_v45 = vpack.c.bf16 %v96_v41, %v95_v40  ;;  %v586_v46 = vpack.c.bf16 %v188_v44, %v187_v43  ;;  %v80_v47 = vld [vmem:[#allocation2] sm:$0xff]  ;;  %v273_v56 = vld [vmem:[#allocation8] sm:$0xff]  ;;  %v274_v57 = vld [vmem:[#allocation8 + $0x8] sm:$0xff] }
  0x55   :  { %551 = vmatpush3.bf16.msra.mxu0 %v550_v14  ;;  %v190_v49 = vld [vmem:[#allocation7 + $0x78] sm:$0xff]  ;;  %v592_v58 = vpack.c.bf16 %v274_v57, %v273_v56  ;;  %v275_v59 = vld [vmem:[#allocation8 + $0x10] sm:$0xff]  ;;  %v277_v62 = vld [vmem:[#allocation8 + $0x20] sm:$0xff] }
  0x56   :  { %552 = vmatprep.subr.bf16.mxu0 %v753_v0  ;;  %v589_v50 = vpack.c.bf16 %v190_v49, %v189_v48  ;;  %v384_v51 = vld [vmem:[%s907_s2] ss:$0 sm:$0xff]  ;;  %v278_v63 = vld [vmem:[#allocation8 + $0x28] sm:$0xff]  ;;  %v279_v2 = vld [vmem:[#allocation8 + $0x30] sm:$0xff] }
  0x57   :  { %575 = vmatpush3.bf16.msra.mxu1 %v574_v24  ;;  %v276_v60 = vld [vmem:[#allocation8 + $0x18] sm:$0xff]  ;;  %v281_v5 = vld [vmem:[#allocation8 + $0x40] sm:$0xff]  ;;  %v282_v6 = vld [vmem:[#allocation8 + $0x48] sm:$0xff] }
  0x58   :  { %576 = vmatprep.subr.bf16.mxu1 %v753_v0  ;;  %v595_v61 = vpack.c.bf16 %v276_v60, %v275_v59  ;;  %v280_v3 = vld [vmem:[#allocation8 + $0x38] sm:$0xff]  ;;  %v604_v7 = vpack.c.bf16 %v282_v6, %v281_v5  ;;  %v283_v8 = vld [vmem:[#allocation8 + $0x50] sm:$0xff]  ;;  %v285_v11 = vld [vmem:[#allocation8 + $0x60] sm:$0xff] }
  0x59   :  { %554 = vmatpush3.bf16.msra.mxu0 %v553_v21  ;;  %v601_v4 = vpack.c.bf16 %v280_v3, %v279_v2  ;;  %v284_v9 = vld [vmem:[#allocation8 + $0x58] sm:$0xff]  ;;  %v286_v12 = vld [vmem:[#allocation8 + $0x68] sm:$0xff]  ;;  %v287_v14 = vld [vmem:[#allocation8 + $0x70] sm:$0xff] }
  0x5a   :  { %555 = vmatprep.subr.bf16.mxu0 %v753_v0  ;;  %v607_v10 = vpack.c.bf16 %v284_v9, %v283_v8  ;;  %v610_v13 = vpack.c.bf16 %v286_v12, %v285_v11  ;;  %v288_v15 = vld [vmem:[#allocation8 + $0x78] sm:$0xff] }
  0x5b   :  { %578 = vmatpush3.bf16.msra.mxu1 %v577_v30  ;;  %v613_v16 = vpack.c.bf16 %v288_v15, %v287_v14  ;;  %v385_v17 = vld [vmem:[%s909_s4] ss:$0 sm:$0xff]  ;;  %s717_s4 = scalar_lea.vmem %s374_s29, 128 }
  0x5c   :  { %579 = vmatprep.subr.bf16.mxu1 %v753_v0  ;;  %p718_p4 = scmp.ne.s32.totalorder %s374_s29, %s717_s4  ;;  %p723_p6 = scmp.lt.s32.totalorder %s717_s4, %s717_s4 }
  0x5d   :  { %557 = vmatpush3.bf16.msra.mxu0 %v556_v27 }
  0x5e   :  { %558 = vmatprep.subr.bf16.mxu0 %v753_v0  ;;  %p724_p7 = por %p723_p6, %p722_p5 }
  0x5f   :  { %581 = vmatpush3.bf16.msra.mxu1 %v580_v36 }
  0x60   :  { %582 = vmatprep.subr.bf16.mxu1 %v753_v0  ;;  %p725_p8 = pnand %p724_p7, %p718_p4 }
  0x61   :  { %560 = vmatpush3.bf16.msra.mxu0 %v559_v33 }
  0x62   :  { %561 = vmatprep.subr.bf16.mxu0 %v753_v0 }
  0x63   :  { %584 = vmatpush3.bf16.msra.mxu1 %v583_v42 }
  0x64   :  { %585 = vmatprep.subr.bf16.mxu1 %v753_v0 }
  0x65   :  { %563 = vmatpush3.bf16.msra.mxu0 %v562_v39 }
  0x66   :  { %564 = vmatprep.subr.bf16.mxu0 %v753_v0 }
  0x67   :  { %587 = vmatpush3.bf16.msra.mxu1 %v586_v46 }
  0x68   :  { %588 = vmatprep.subr.bf16.mxu1 %v753_v0 }
  0x69   :  { %566 = vmatpush3.bf16.msra.mxu0 %v565_v45 }
  0x6a   :  { %591 = vmatprep.subr.bf16.mxu0 %v753_v0 }
  0x6b   :  { %590 = vmatpush3.bf16.msra.mxu1 %v589_v50 }
  0x6c   :  { %471 = vmatmul.mubr.f32.vlgmr.msra.gmra.mrb[0].mxu0 %v80_v47 }
  0x6d   :  { %540 = vmatprep.mubr.msk.f32.mxu0 %vm754_vm0, %v755_v1  ;;  %593 = vmatpush3.bf16.msra.mxu0 %v592_v58  ;;  %v598_v1 = vpack.c.bf16 %v278_v63, %v277_v62 }
  0x6e   :  { %594 = vmatprep.subr.bf16.mxu0 %v753_v0 }
  0x71   :  { %596 = vmatpush3.bf16.msra.mxu0 %v595_v61 }
  0x72   :  { %597 = vmatprep.subr.bf16.mxu0 %v753_v0 }
  0x75   :  { %599 = vmatpush3.bf16.msra.mxu0 %v598_v1 }
  0x76   :  { %600 = vmatprep.subr.bf16.mxu0 %v753_v0 }
  0x79   :  { %602 = vmatpush3.bf16.msra.mxu0 %v601_v4 }
  0x7a   :  { %603 = vmatprep.subr.bf16.mxu0 %v753_v0 }
  0x7d   :  { %605 = vmatpush3.bf16.msra.mxu0 %v604_v7 }
  0x7e   :  { %606 = vmatprep.subr.bf16.mxu0 %v753_v0 }
  0x81   :  { %608 = vmatpush3.bf16.msra.mxu0 %v607_v10 }
  0x82   :  { %609 = vmatprep.subr.bf16.mxu0 %v753_v0 }
  0x85   :  { %611 = vmatpush3.bf16.msra.mxu0 %v610_v13 }
  0x86   :  { %612 = vmatprep.subr.bf16.mxu0 %v753_v0  ;;  %v386_v0 = vld [vmem:[%s911_s6] ss:$0 sm:$0xff] }
  0x89   :  { %614 = vmatpush3.bf16.msra.mxu0 %v613_v16 }
 0x13f   :  { %v170_v52 = vpop.f32.mrb[0].mxu0 }
 0x140   :  { %v171_v53 = vadd.f32 %v384_v51, %v170_v52  ;;  %v472_v54 = vpop.f32.mrb[1].mxu0 }
 0x142   :  { %v174_v55 = vmax.f32 %v171_v53, 0.0 }
 0x144   :  { %506 = vmatmul.mubr.f32.vlgmr.msra.gmra.mrb[0].mxu1 %v174_v55 }
 0x217   :  { %v264_v18 = vpop.f32.mrb[0].mxu1 }
 0x218   :  { %v265_v19 = vadd.f32 %v385_v17, %v264_v18  ;;  %v507_v20 = vpop.f32.mrb[1].mxu1 }
 0x21a   :  { %v268_v21 = vsub.f32 0.0, %v265_v19 }
 0x21c   :  { %v269_v22 = vmul.f32 1.442695, %v268_v21 }
 0x21e   :  { %625 = vpow2.f32 %v269_v22 }
 0x228   :  { %v626_v23 = vpop.eup %625 }
 0x229   :  { %v271_v24 = vadd.f32 1.0, %v626_v23 }
 0x22b   :  { %627 = vrcp.f32 %v271_v24 }
 0x235   :  { %v628_v25 = vpop.eup %627 }
 0x236   :  { %541 = vmatmul.mubr.f32.vlgmr.msra.gmra.mrb[2].mxu0 %v628_v25 }
 0x309   :  { %v362_v26 = vpop.f32.mrb[2].mxu0 }
 0x30a   :  { %v363_v27 = vadd.f32 %v386_v0, %v362_v26  ;;  %v542_v28 = vpop.f32.mrb[3].mxu0 }
 0x30c   :  { %366 = vst [vmem:[#allocation10] sm:$0xff] %v363_v27 }
 0x30d   :  { %728 = shalt.err (!%p725_p8)
}
 0x30e   :  { %s729_s9 = scalar_lea.hbm %s912_s7, 128 }
 0x30f   :  { %p730_p9 = scmp.ne.s32.totalorder %s912_s7, %s729_s9  ;;  %p733_p10 = scmp.lt.u32.totalorder %s729_s9, %s912_s7 }
 0x311   :  { %p735_p11 = pnand %p733_p10, %p730_p9 }
 0x313   :  { %738 = shalt.err (!%p735_p11)
}
 0x314   :  { %376 = dma.vmem_to_hbm [thread:$0]  %s374_s29, 128, %s912_s7, [#allocation4]  }
 0x315   :  { %745 = dma.done.wait [#allocation4], 128  }
 0x316   :  { %746 = vsyncadd [#allocation4], 4294967168 }
 0x317   :  { %380 = vsyncpa [#allocation3], 1 }
 0x318   :  { %381 = vsyncpa [#allocation6], 1 }
 0x319   :  { %382 = vsyncpa [#allocation9], 1 }
 0x31a   :  { %383 = vsyncpa [#allocation4], 1 }

</bundles_post_ra>
